<compile_context>
chip_gen: v7x
topology: tpu7x:2x2x1
jax: 0.10.0
libtpu: 0.0.40
codegen_flags: <defaults>
</compile_context>

<pallas_src>
import functools

import jax
import jax.numpy as jnp
from jax.experimental import pallas as pl
from jax.experimental.pallas import tpu as pltpu


# ----------------------------------------------------------------------------
# Kernel: fused 4-layer MLP in feature-major ("batch in lanes") layout.
#   x_ref : (d_in, TN)            compute dtype (f32 or bf16)
#   wK_ref: (d_out_K, d_in_K)     compute dtype (PyTorch orientation)
#   b_ref : (64+32+16+d_out, 1)   f32, all biases concatenated
#   o_ref : (d_out, TN)
# ----------------------------------------------------------------------------
def volume_net_kernel(x_ref,
                      w1_ref, w2_ref, w3_ref, w4_ref,
                      b_ref,
                      o_ref,
                      *, dims):
    d1, d2, d3, d4 = dims
    cdtype = x_ref.dtype

    b = b_ref[...]                                                    # (sum_d, 1) f32
    x = x_ref[...]                                                    # (d_in, TN)

    h = jnp.dot(w1_ref[...], x, preferred_element_type=jnp.float32)  # (64, TN) f32
    h = jnp.maximum(h + b[0:d1], 0.0)

    h = jnp.dot(w2_ref[...], h.astype(cdtype),
                preferred_element_type=jnp.float32)                  # (32, TN)
    h = jnp.maximum(h + b[d1:d1 + d2], 0.0)

    h = jnp.dot(w3_ref[...], h.astype(cdtype),
                preferred_element_type=jnp.float32)                  # (16, TN)
    h = jnp.maximum(h + b[d1 + d2:d1 + d2 + d3], 0.0)

    h = jnp.dot(w4_ref[...], h.astype(cdtype),
                preferred_element_type=jnp.float32)                  # (d_out, TN)
    h = h + b[d1 + d2 + d3:d1 + d2 + d3 + d4]

    o_ref[...] = h.astype(o_ref.dtype)


# ----------------------------------------------------------------------------
# Wrapper: keeps the PyTorch-facing semantics  [N, d_in] -> [N, d_out].
# ----------------------------------------------------------------------------
def volume_net_forward(x, params, *, tile_n=1024, compute_dtype=jnp.float32):
    """x: [N, input_dim]; params: list of (W [out,in], b [out]) per layer."""
    N, d_in = x.shape
    ws = [w for (w, _) in params]
    bs = [b for (_, b) in params]
    dims = tuple(int(w.shape[0]) for w in ws)          # (64, 32, 16, d_out)
    d_out = dims[-1]

    # Adaptive tile: never pad beyond the 128-rounded batch for small inputs.
    n_round = 128 * pl.cdiv(N, 128)
    tile_n = max(128, min(tile_n, n_round))

    # Batch-in-lanes layout: features -> sublanes, batch -> 128-wide lane dim.
    xt = x.astype(compute_dtype).T                     # (d_in, N)

    # Pad the batch so the tile size is free to be performance-optimal.
    n_pad = tile_n * pl.cdiv(N, tile_n)
    if n_pad != N:
        xt = jnp.pad(xt, ((0, 0), (0, n_pad - N)))

    ws = [w.astype(compute_dtype) for w in ws]
    # One resident bias column in f32 (bias-add / ReLU stay f32: v5e-safe).
    b_all = jnp.concatenate([b.reshape(-1) for b in bs]).astype(jnp.float32)[:, None]

    grid = (n_pad // tile_n,)

    def const_spec(shape):
        # Constant index_map: same block every step -> stays resident in VMEM.
        return pl.BlockSpec(shape, lambda i: (0, 0))

    kernel = functools.partial(volume_net_kernel, dims=dims)

    out_t = pl.pallas_call(
        kernel,
        out_shape=jax.ShapeDtypeStruct((d_out, n_pad), compute_dtype),
        grid_spec=pltpu.PrefetchScalarGridSpec(
            num_scalar_prefetch=0,
            grid=grid,
            in_specs=[
                pl.BlockSpec((d_in, tile_n), lambda i: (0, i)),   # lane-dense x tile
                const_spec(ws[0].shape), const_spec(ws[1].shape),
                const_spec(ws[2].shape), const_spec(ws[3].shape),
                const_spec(b_all.shape),
            ],
            out_specs=pl.BlockSpec((d_out, tile_n), lambda i: (0, i)),
        ),
        compiler_params=pltpu.CompilerParams(
            dimension_semantics=("parallel",)),       # megacore split on v7x
    )(xt, *ws, b_all)

    return out_t[:, :N].T                              # back to [N, d_out]


# ----------------------------------------------------------------------------
# Deterministic parameter init mimicking torch.nn.Linear defaults:
# U(-k, k), k = 1/sqrt(fan_in); weights in PyTorch orientation [fan_out, fan_in].
# ----------------------------------------------------------------------------
def init_params(key, input_dim=3, output_dim=3):
    layer_dims = [input_dim, 64, 32, 16, output_dim]
    params = []
    for i in range(len(layer_dims) - 1):
        fan_in, fan_out = layer_dims[i], layer_dims[i + 1]
        key, kw, kb = jax.random.split(key, 3)
        bound = 1.0 / jnp.sqrt(fan_in)
        w = jax.random.uniform(kw, (fan_out, fan_in), jnp.float32, -bound, bound)
        b = jax.random.uniform(kb, (fan_out,), jnp.float32, -bound, bound)
        params.append((w, b))
    return params


def reference_forward(x, params):
    h = x
    for i, (w, b) in enumerate(params):
        h = h @ w.T + b
        if i < len(params) - 1:
            h = jnp.maximum(h, 0.0)
    return h


if __name__ == "__main__":
    key = jax.random.PRNGKey(0)
    key, kx1, kx2 = jax.random.split(key, 3)

    input_dim, output_dim = 3, 3
    params = init_params(key, input_dim, output_dim)

    # Case 1: batch that is a clean multiple of the tile.
    N1 = 1024
    x1 = jax.random.normal(kx1, (N1, input_dim), jnp.float32)
    ref1 = reference_forward(x1, params)
    out1 = jax.block_until_ready(volume_net_forward(x1, params))
    assert out1.shape == (N1, output_dim)
    assert jnp.allclose(out1, ref1, atol=1e-4, rtol=1e-4), "f32 mismatch (N=1024)"

    # Case 2: ragged batch (exercises the padding / adaptive-tile path).
    N2 = 777
    x2 = jax.random.normal(kx2, (N2, input_dim), jnp.float32)
    ref2 = reference_forward(x2, params)
    out2 = jax.block_until_ready(volume_net_forward(x2, params))
    assert out2.shape == (N2, output_dim)
    assert jnp.allclose(out2, ref2, atol=1e-4, rtol=1e-4), "f32 mismatch (N=777)"

    # Case 3: bf16 compute path (halves HBM traffic; f32 accumulation + bias/ReLU).
    out_bf16 = jax.block_until_ready(
        volume_net_forward(x1, params, compute_dtype=jnp.bfloat16))
    assert jnp.allclose(out_bf16.astype(jnp.float32), ref1, atol=5e-2, rtol=5e-2), \
        "bf16 mismatch vs reference"

    print("KERNEL_OK")
</pallas_src>

<mosaic_0001>
module attributes {stable_mosaic.version = 11 : i64} {
  func.func @volume_net_kernel(%arg0: i32, %arg1: memref<3x1024xf32, #tpu.memory_space<vmem>>, %arg2: memref<64x3xf32, #tpu.memory_space<vmem>>, %arg3: memref<32x64xf32, #tpu.memory_space<vmem>>, %arg4: memref<16x32xf32, #tpu.memory_space<vmem>>, %arg5: memref<3x16xf32, #tpu.memory_space<vmem>>, %arg6: memref<115x1xf32, #tpu.memory_space<vmem>>, %arg7: memref<3x1024xf32, #tpu.memory_space<vmem>>) attributes {dimension_semantics = [#tpu.dimension_semantics<parallel>], iteration_bounds = array<i64: 1>, scalar_prefetch = 0 : i64, scratch_operands = 0 : i64, tpu.core_type = #tpu.core_type<tc>, window_params = [{transform_indices = @transform_0, window_bounds = array<i64: 3, 1024>}, {pipeline_mode = #tpu.pipeline_mode<synchronous>, transform_indices = @transform_1, window_bounds = array<i64: 64, 3>}, {pipeline_mode = #tpu.pipeline_mode<synchronous>, transform_indices = @transform_2, window_bounds = array<i64: 32, 64>}, {pipeline_mode = #tpu.pipeline_mode<synchronous>, transform_indices = @transform_3, window_bounds = array<i64: 16, 32>}, {pipeline_mode = #tpu.pipeline_mode<synchronous>, transform_indices = @transform_4, window_bounds = array<i64: 3, 16>}, {pipeline_mode = #tpu.pipeline_mode<synchronous>, transform_indices = @transform_5, window_bounds = array<i64: 115, 1>}, {transform_indices = @transform_6, window_bounds = array<i64: 3, 1024>}]} {
    %c0 = arith.constant 0 : index
    %c0_0 = arith.constant 0 : index
    %0 = vector.load %arg6[%c0, %c0_0] : memref<115x1xf32, #tpu.memory_space<vmem>>, vector<115x1xf32>
    %c0_1 = arith.constant 0 : index
    %c0_2 = arith.constant 0 : index
    %1 = vector.load %arg1[%c0_1, %c0_2] : memref<3x1024xf32, #tpu.memory_space<vmem>>, vector<3x1024xf32>
    %c0_3 = arith.constant 0 : index
    %c0_4 = arith.constant 0 : index
    %2 = vector.load %arg2[%c0_3, %c0_4] : memref<64x3xf32, #tpu.memory_space<vmem>>, vector<64x3xf32>
    %cst = arith.constant dense<0.000000e+00> : vector<64x1024xf32>
    %3 = tpu.matmul %2, %1, %cst {dimension_numbers = #tpu.dot_dimension_numbers<[1], [0], [0], [1], [0, 0, 1, 1], [], []>} : vector<64x3xf32>, vector<3x1024xf32>, vector<64x1024xf32> -> vector<64x1024xf32>
    %4 = vector.extract_strided_slice %0 {offsets = [0, 0], sizes = [64, 1], strides = [1, 1]} : vector<115x1xf32> to vector<64x1xf32>
    %5 = vector.broadcast %4 : vector<64x1xf32> to vector<64x1024xf32>
    %6 = arith.addf %3, %5 : vector<64x1024xf32>
    %cst_5 = arith.constant 0.000000e+00 : f32
    %7 = vector.broadcast %cst_5 : f32 to vector<64x1024xf32>
    %8 = arith.maximumf %6, %7 : vector<64x1024xf32>
    %c0_6 = arith.constant 0 : index
    %c0_7 = arith.constant 0 : index
    %9 = vector.load %arg3[%c0_6, %c0_7] : memref<32x64xf32, #tpu.memory_space<vmem>>, vector<32x64xf32>
    %cst_8 = arith.constant dense<0.000000e+00> : vector<32x1024xf32>
    %10 = tpu.matmul %9, %8, %cst_8 {dimension_numbers = #tpu.dot_dimension_numbers<[1], [0], [0], [1], [0, 0, 1, 1], [], []>} : vector<32x64xf32>, vector<64x1024xf32>, vector<32x1024xf32> -> vector<32x1024xf32>
    %11 = vector.extract_strided_slice %0 {offsets = [64, 0], sizes = [32, 1], strides = [1, 1]} : vector<115x1xf32> to vector<32x1xf32>
    %12 = vector.broadcast %11 : vector<32x1xf32> to vector<32x1024xf32>
    %13 = arith.addf %10, %12 : vector<32x1024xf32>
    %cst_9 = arith.constant 0.000000e+00 : f32
    %14 = vector.broadcast %cst_9 : f32 to vector<32x1024xf32>
    %15 = arith.maximumf %13, %14 : vector<32x1024xf32>
    %c0_10 = arith.constant 0 : index
    %c0_11 = arith.constant 0 : index
    %16 = vector.load %arg4[%c0_10, %c0_11] : memref<16x32xf32, #tpu.memory_space<vmem>>, vector<16x32xf32>
    %cst_12 = arith.constant dense<0.000000e+00> : vector<16x1024xf32>
    %17 = tpu.matmul %16, %15, %cst_12 {dimension_numbers = #tpu.dot_dimension_numbers<[1], [0], [0], [1], [0, 0, 1, 1], [], []>} : vector<16x32xf32>, vector<32x1024xf32>, vector<16x1024xf32> -> vector<16x1024xf32>
    %18 = vector.extract_strided_slice %0 {offsets = [96, 0], sizes = [16, 1], strides = [1, 1]} : vector<115x1xf32> to vector<16x1xf32>
    %19 = vector.broadcast %18 : vector<16x1xf32> to vector<16x1024xf32>
    %20 = arith.addf %17, %19 : vector<16x1024xf32>
    %cst_13 = arith.constant 0.000000e+00 : f32
    %21 = vector.broadcast %cst_13 : f32 to vector<16x1024xf32>
    %22 = arith.maximumf %20, %21 : vector<16x1024xf32>
    %c0_14 = arith.constant 0 : index
    %c0_15 = arith.constant 0 : index
    %23 = vector.load %arg5[%c0_14, %c0_15] : memref<3x16xf32, #tpu.memory_space<vmem>>, vector<3x16xf32>
    %cst_16 = arith.constant dense<0.000000e+00> : vector<3x1024xf32>
    %24 = tpu.matmul %23, %22, %cst_16 {dimension_numbers = #tpu.dot_dimension_numbers<[1], [0], [0], [1], [0, 0, 1, 1], [], []>} : vector<3x16xf32>, vector<16x1024xf32>, vector<3x1024xf32> -> vector<3x1024xf32>
    %25 = vector.extract_strided_slice %0 {offsets = [112, 0], sizes = [3, 1], strides = [1, 1]} : vector<115x1xf32> to vector<3x1xf32>
    %26 = vector.broadcast %25 : vector<3x1xf32> to vector<3x1024xf32>
    %27 = arith.addf %24, %26 : vector<3x1024xf32>
    %c0_17 = arith.constant 0 : index
    %c0_18 = arith.constant 0 : index
    %28 = vector.load %arg7[%c0_17, %c0_18] : memref<3x1024xf32, #tpu.memory_space<vmem>>, vector<3x1024xf32>
    tpu.vector_store %arg7[%c0_17, %c0_18], %27 {strides = array<i32>} : memref<3x1024xf32, #tpu.memory_space<vmem>>, vector<3x1024xf32>,
    return
  }
  func.func @transform_0(%arg0: i32) -> (i32, i32) {
    %c0_i32 = arith.constant 0 : i32
    %c0_i32_0 = arith.constant 0 : i32
    return %c0_i32, %arg0 : i32, i32
  }
  func.func @transform_1(%arg0: i32) -> (i32, i32) {
    %c0_i32 = arith.constant 0 : i32
    %c0_i32_0 = arith.constant 0 : i32
    %c0_i32_1 = arith.constant 0 : i32
    return %c0_i32, %c0_i32_0 : i32, i32
  }
  func.func @transform_2(%arg0: i32) -> (i32, i32) {
    %c0_i32 = arith.constant 0 : i32
    %c0_i32_0 = arith.constant 0 : i32
    %c0_i32_1 = arith.constant 0 : i32
    return %c0_i32, %c0_i32_0 : i32, i32
  }
  func.func @transform_3(%arg0: i32) -> (i32, i32) {
    %c0_i32 = arith.constant 0 : i32
    %c0_i32_0 = arith.constant 0 : i32
    %c0_i32_1 = arith.constant 0 : i32
    return %c0_i32, %c0_i32_0 : i32, i32
  }
  func.func @transform_4(%arg0: i32) -> (i32, i32) {
    %c0_i32 = arith.constant 0 : i32
    %c0_i32_0 = arith.constant 0 : i32
    %c0_i32_1 = arith.constant 0 : i32
    return %c0_i32, %c0_i32_0 : i32, i32
  }
  func.func @transform_5(%arg0: i32) -> (i32, i32) {
    %c0_i32 = arith.constant 0 : i32
    %c0_i32_0 = arith.constant 0 : i32
    %c0_i32_1 = arith.constant 0 : i32
    return %c0_i32, %c0_i32_0 : i32, i32
  }
  func.func @transform_6(%arg0: i32) -> (i32, i32) {
    %c0_i32 = arith.constant 0 : i32
    %c0_i32_0 = arith.constant 0 : i32
    return %c0_i32, %arg0 : i32, i32
  }
}

</mosaic_0001>

<bundles_post_ra>
// kernel: tpu_custom_call.1
= control target key start
LH: loop header
LB: loop body
LE: loop exit
PB: predicated region body
PF: predicated region fallthrough
CT: control target
= control target key end

     0   :  { %vm124_vm0 = vcmask 1042432   ;;  %v1966_v4 = vmov 0.0   ;;  %vm99_vm1 = vcmask 23552   ;;  %s2420_s0 = inlined_call_operand.vmem [shape: f32[3,1024], index: 0, kind: input, shape index: {}]   ;;  %s2421_s1 = inlined_call_operand.vmem [shape: f32[64,3], index: 1, kind: input, shape index: {}]   ;;  %s2422_s2 = inlined_call_operand.vmem [shape: f32[32,64], index: 2, kind: input, shape index: {}]   ;;  %s2423_s3 = inlined_call_operand.vmem [shape: f32[16,32], index: 3, kind: input, shape index: {}]   ;;  %s2424_s4 = inlined_call_operand.vmem [shape: f32[3,16], index: 4, kind: input, shape index: {}]   ;;  %s2425_s5 = inlined_call_operand.vmem [shape: f32[115,1], index: 5, kind: input, shape index: {}]   ;;  %s2426_s6 = inlined_call_operand.hbm [shape: f32[3,1024], index: 6, kind: output, shape index: {}]  }
   0x1   :  { %v39_v0 = vld [vmem:[%s2420_s0] sm:$0x77]  ;;  %v40_v1 = vld [vmem:[%s2420_s0 + $0x8] sm:$0x77]  ;;  %205 = vmatprep.mubr.f32.mxu0 %v1966_v4  ;;  %318 = vmatprep.mubr.f32.mxu1 %v1966_v4  ;;  %v41_v5 = vld [vmem:[%s2420_s0 + $0x10] sm:$0x77] }
   0x2   :  { %v95_v2 = vcombine.high %v39_v0, %v39_v0  ;;  %v96_v3 = vcombine.high %v40_v1, %v40_v1  ;;  %v42_v6 = vld [vmem:[%s2420_s0 + $0x18] sm:$0x77]  ;;  %v2021_v7 = vld [vmem:[%s2421_s1] sm:$0xff]  ;;  %v97_v8 = vcombine.high %v41_v5, %v41_v5  ;;  %v2036_v10 = vld [vmem:[%s2421_s1 + $0x8] sm:$0xff] }
   0x3   :  { %v98_v9 = vcombine.high %v42_v6, %v42_v6  ;;  %v24_v11 = vld [vmem:[%s2425_s5] sm:$0xff]  ;;  %v26_v12 = vld [vmem:[%s2425_s5 + $0x10] sm:$0xff] }
   0x4   :  { %1753 = vmatprep.subr.msk.mxu0 %vm124_vm0, %v95_v2  ;;  %1763 = vmatprep.subr.msk.mxu1 %vm124_vm0, %v96_v3 }
   0x5   :  { %1754 = vmatpush1.msk.msra.mxu0 %vm124_vm0, %v39_v0  ;;  %1764 = vmatpush1.msk.msra.mxu1 %vm124_vm0, %v40_v1 }
   0x6   :  { %1755 = vmatmul.mubr.msk.f32.vlgmr.msra.gmra.mrb[0].mxu0 %vm99_vm1, %v2021_v7  ;;  %1765 = vmatmul.mubr.msk.f32.vlgmr.msra.gmra.mrb[0].mxu1 %vm99_vm1, %v2021_v7 }
   0x7   :  { %1773 = vmatprep.subr.msk.mxu0 %vm124_vm0, %v97_v8  ;;  %1783 = vmatprep.subr.msk.mxu1 %vm124_vm0, %v98_v9 }
   0x8   :  { %1774 = vmatpush1.msk.msra.mxu0 %vm124_vm0, %v41_v5  ;;  %1784 = vmatpush1.msk.msra.mxu1 %vm124_vm0, %v42_v6 }
   0x9   :  { %211 = vmatprep.mubr.f32.mxu0 %v1966_v4  ;;  %324 = vmatprep.mubr.f32.mxu1 %v1966_v4 }
   0xa   :  { %1756 = vmatmul.mubr.msk.f32.gmra.mrb[2].mxu0 %vm99_vm1, %v2036_v10  ;;  %1766 = vmatmul.mubr.msk.f32.gmra.mrb[2].mxu1 %vm99_vm1, %v2036_v10 }
   0xb   :  { %11 = vsyncpa [#allocation3], 0  ;;  %217 = vmatprep.mubr.f32.mxu0 %v1966_v4  ;;  %330 = vmatprep.mubr.f32.mxu1 %v1966_v4  ;;  %v2057_v13 = vld [vmem:[%s2421_s1 + $0x10] sm:$0xff]  ;;  %v1967_v14 = vmov 0   ;;  %v25_v15 = vld [vmem:[%s2425_s5 + $0x8] sm:$0xff]  ;;  %vm681_vm2 = vcmask 523264  }
   0xc   :  { %1936 = vset.pattern.permute.xlu0 %v1967_v14  ;;  %1937 = vset.pattern.permute.xlu1 %v1967_v14  ;;  %v27_v16 = vld [vmem:[%s2425_s5 + $0x18] sm:$0xff]  ;;  %v28_v18 = vld [vmem:[%s2425_s5 + $0x20] sm:$0xff]  ;;  %v29_v19 = vld [vmem:[%s2425_s5 + $0x28] sm:$0xff]  ;;  %vm1094_vm3 = vcmask 261120   ;;  %vm1431_vm4 = vcmask 130048  }
   0xd   :  { %53 = vperm.xlu0 %1936, %v24_v11   ;;  %63 = vperm.xlu1 %1937, %v26_v12   ;;  %v46_v17 = vld [vmem:[%s2421_s1 + $0x18] sm:$0xff]  ;;  %v47_v20 = vld [vmem:[%s2421_s1 + $0x20] sm:$0xff]  ;;  %v30_v21 = vld [vmem:[%s2425_s5 + $0x30] sm:$0xff] }
   0xe   :  { %1757 = vmatmul.mubr.msk.f32.gmra.mrb[4].mxu0 %vm99_vm1, %v2057_v13  ;;  %1767 = vmatmul.mubr.msk.f32.gmra.mrb[4].mxu1 %vm99_vm1, %v2057_v13  ;;  %v31_v22 = vld [vmem:[%s2425_s5 + $0x38] sm:$0xff]  ;;  %v48_v23 = vld [vmem:[%s2421_s1 + $0x28] sm:$0xff]  ;;  %v32_v24 = vld [vmem:[%s2425_s5 + $0x40] sm:$0xff] }
   0xf   :  { %223 = vmatprep.mubr.f32.mxu0 %v1966_v4  ;;  %336 = vmatprep.mubr.f32.mxu1 %v1966_v4  ;;  %v33_v25 = vld [vmem:[%s2425_s5 + $0x48] sm:$0xff]  ;;  %v49_v26 = vld [vmem:[%s2421_s1 + $0x30] sm:$0xff]  ;;  %v35_v28 = vld [vmem:[%s2425_s5 + $0x58] sm:$0xff] }
  0x10   :  { %v34_v27 = vld [vmem:[%s2425_s5 + $0x50] sm:$0xff]  ;;  %v50_v29 = vld [vmem:[%s2421_s1 + $0x38] sm:$0xff]  ;;  %v36_v30 = vld [vmem:[%s2425_s5 + $0x60] sm:$0xff] }
  0x11   :  { %58 = vperm.xlu0 %1936, %v25_v15   ;;  %68 = vperm.xlu1 %1937, %v27_v16   ;;  %v37_v31 = vld [vmem:[%s2425_s5 + $0x68] sm:$0xff]  ;;  %v38_v32 = vld [vmem:[%s2425_s5 + $0x70] sm:$0x7] }
  0x12   :  { %1758 = vmatmul.mubr.msk.f32.gmra.mrb[6].mxu0 %vm99_vm1, %v46_v17  ;;  %1768 = vmatmul.mubr.msk.f32.gmra.mrb[6].mxu1 %vm99_vm1, %v46_v17 }
  0x13   :  { %229 = vmatprep.mubr.f32.mxu0 %v1966_v4  ;;  %342 = vmatprep.mubr.f32.mxu1 %v1966_v4 }
  0x15   :  { %73 = vperm.xlu0 %1936, %v28_v18   ;;  %78 = vperm.xlu1 %1937, %v29_v19  }
  0x16   :  { %1759 = vmatmul.mubr.msk.f32.gmra.mrb[8].mxu0 %vm99_vm1, %v47_v20  ;;  %1769 = vmatmul.mubr.msk.f32.gmra.mrb[8].mxu1 %vm99_vm1, %v47_v20 }
  0x17   :  { %235 = vmatprep.mubr.f32.mxu0 %v1966_v4  ;;  %348 = vmatprep.mubr.f32.mxu1 %v1966_v4 }
  0x19   :  { %83 = vperm.xlu0 %1936, %v30_v21   ;;  %88 = vperm.xlu1 %1937, %v31_v22  }
  0x1a   :  { %1760 = vmatmul.mubr.msk.f32.gmra.mrb[10].mxu0 %vm99_vm1, %v48_v23  ;;  %1770 = vmatmul.mubr.msk.f32.gmra.mrb[10].mxu1 %vm99_vm1, %v48_v23 }
  0x1b   :  { %241 = vmatprep.mubr.f32.mxu0 %v1966_v4  ;;  %354 = vmatprep.mubr.f32.mxu1 %v1966_v4 }
  0x1d   :  { %663 = vperm.xlu0 %1936, %v32_v24   ;;  %668 = vperm.xlu1 %1937, %v33_v25  }
  0x1e   :  { %1761 = vmatmul.mubr.msk.f32.gmra.mrb[12].mxu0 %vm99_vm1, %v49_v26  ;;  %1771 = vmatmul.mubr.msk.f32.gmra.mrb[12].mxu1 %vm99_vm1, %v49_v26 }
  0x1f   :  { %247 = vmatprep.mubr.f32.mxu0 %v1966_v4  ;;  %360 = vmatprep.mubr.f32.mxu1 %v1966_v4 }
  0x21   :  { %673 = vperm.xlu0 %1936, %v34_v27   ;;  %678 = vperm.xlu1 %1937, %v35_v28  }
  0x22   :  { %1762 = vmatmul.mubr.msk.f32.gmra.mrb[14].mxu0 %vm99_vm1, %v50_v29  ;;  %1772 = vmatmul.mubr.msk.f32.gmra.mrb[14].mxu1 %vm99_vm1, %v50_v29 }
  0x23   :  { %431 = vmatprep.mubr.f32.mxu0 %v1966_v4  ;;  %544 = vmatprep.mubr.f32.mxu1 %v1966_v4 }
  0x25   :  { %1086 = vperm.xlu0 %1936, %v36_v30   ;;  %1091 = vperm.xlu1 %1937, %v37_v31  }
  0x26   :  { %1775 = vmatmul.mubr.msk.f32.vlgmr.msra.gmra.mrb[16].mxu0 %vm99_vm1, %v2021_v7  ;;  %1785 = vmatmul.mubr.msk.f32.vlgmr.msra.gmra.mrb[16].mxu1 %vm99_vm1, %v2021_v7 }
  0x27   :  { %437 = vmatprep.mubr.f32.mxu0 %v1966_v4  ;;  %550 = vmatprep.mubr.f32.mxu1 %v1966_v4 }
  0x29   :  { %1428 = vperm.xlu0 %1936, %v38_v32  }
  0x2a   :  { %1776 = vmatmul.mubr.msk.f32.gmra.mrb[18].mxu0 %vm99_vm1, %v2036_v10  ;;  %1786 = vmatmul.mubr.msk.f32.gmra.mrb[18].mxu1 %vm99_vm1, %v2036_v10 }
  0x2b   :  { %443 = vmatprep.mubr.f32.mxu0 %v1966_v4  ;;  %556 = vmatprep.mubr.f32.mxu1 %v1966_v4 }
  0x2e   :  { %1777 = vmatmul.mubr.msk.f32.gmra.mrb[20].mxu0 %vm99_vm1, %v2057_v13  ;;  %1787 = vmatmul.mubr.msk.f32.gmra.mrb[20].mxu1 %vm99_vm1, %v2057_v13 }
  0x2f   :  { %449 = vmatprep.mubr.f32.mxu0 %v1966_v4  ;;  %562 = vmatprep.mubr.f32.mxu1 %v1966_v4 }
  0x32   :  { %1778 = vmatmul.mubr.msk.f32.gmra.mrb[22].mxu0 %vm99_vm1, %v46_v17  ;;  %1788 = vmatmul.mubr.msk.f32.gmra.mrb[22].mxu1 %vm99_vm1, %v46_v17 }
  0x33   :  { %455 = vmatprep.mubr.f32.mxu0 %v1966_v4  ;;  %568 = vmatprep.mubr.f32.mxu1 %v1966_v4 }
  0x36   :  { %1779 = vmatmul.mubr.msk.f32.gmra.mrb[24].mxu0 %vm99_vm1, %v47_v20  ;;  %1789 = vmatmul.mubr.msk.f32.gmra.mrb[24].mxu1 %vm99_vm1, %v47_v20 }
  0x37   :  { %461 = vmatprep.mubr.f32.mxu0 %v1966_v4  ;;  %574 = vmatprep.mubr.f32.mxu1 %v1966_v4 }
  0x3a   :  { %1780 = vmatmul.mubr.msk.f32.gmra.mrb[26].mxu0 %vm99_vm1, %v48_v23  ;;  %1790 = vmatmul.mubr.msk.f32.gmra.mrb[26].mxu1 %vm99_vm1, %v48_v23 }
  0x3b   :  { %467 = vmatprep.mubr.f32.mxu0 %v1966_v4  ;;  %580 = vmatprep.mubr.f32.mxu1 %v1966_v4 }
  0x3e   :  { %1781 = vmatmul.mubr.msk.f32.gmra.mrb[28].mxu0 %vm99_vm1, %v49_v26  ;;  %1791 = vmatmul.mubr.msk.f32.gmra.mrb[28].mxu1 %vm99_vm1, %v49_v26 }
  0x3f   :  { %473 = vmatprep.mubr.f32.mxu0 %v1966_v4  ;;  %586 = vmatprep.mubr.f32.mxu1 %v1966_v4 }
  0x42   :  { %1782 = vmatmul.mubr.msk.f32.gmra.mrb[30].mxu0 %vm99_vm1, %v50_v29  ;;  %1792 = vmatmul.mubr.msk.f32.gmra.mrb[30].mxu1 %vm99_vm1, %v50_v29 }
  0x43   :  { %758 = vmatprep.mubr.f32.mxu0 %v1966_v4  ;;  %847 = vmatprep.mubr.f32.mxu1 %v1966_v4 }
  0x8c   :  { %v2177_v33 = vpop.permute.xlu0 %53  ;;  %v2181_v39 = vpop.permute.xlu1 %63 }
  0x90   :  { %v2179_v38 = vpop.permute.xlu0 %58  ;;  %v2191_v2 = vpop.permute.xlu1 %68 }
  0x94   :  { %v2201_v32 = vpop.permute.xlu0 %73 }
  0xd9   :  { %v207_v34 = vpop.f32.mrb[0].mxu0  ;;  %v320_v35 = vpop.f32.mrb[0].mxu1 }
  0xda   :  { %v209_v36 = vpop.f32.mrb[1].mxu0  ;;  %v322_v37 = vpop.f32.mrb[1].mxu1  ;;  %v208_v40 = vadd.f32 %v207_v34, %v2177_v33  ;;  %v321_v41 = vadd.f32 %v320_v35, %v2177_v33 }
  0xdb   :  { %v210_v42 = vadd.f32 %v209_v36, %v2177_v33  ;;  %v323_v43 = vadd.f32 %v322_v37, %v2177_v33  ;;  %v2203_v36 = vpop.permute.xlu1 %78 }
  0xdc   :  { %v593_v52 = vmax.f32 %v208_v40, 0.0  ;;  %v595_v53 = vmax.f32 %v321_v41, 0.0 }
  0xdd   :  { %v213_v44 = vpop.f32.mrb[2].mxu0  ;;  %v326_v45 = vpop.f32.mrb[2].mxu1  ;;  %v594_v56 = vmax.f32 %v210_v42, 0.0  ;;  %v596_v57 = vmax.f32 %v323_v43, 0.0 }
  0xde   :  { %v214_v46 = vadd.f32 %v213_v44, %v2179_v38  ;;  %v327_v47 = vadd.f32 %v326_v45, %v2179_v38  ;;  %v215_v48 = vpop.f32.mrb[3].mxu0  ;;  %v328_v49 = vpop.f32.mrb[3].mxu1 }
  0xdf   :  { %v216_v50 = vadd.f32 %v215_v48, %v2179_v38  ;;  %v329_v51 = vadd.f32 %v328_v49, %v2179_v38 }
  0xe0   :  { %v601_v54 = vmax.f32 %v214_v46, 0.0  ;;  %v603_v55 = vmax.f32 %v327_v47, 0.0 }
  0xe1   :  { %v602_v58 = vmax.f32 %v216_v50, 0.0  ;;  %v604_v59 = vmax.f32 %v329_v51, 0.0  ;;  %v219_v60 = vpop.f32.mrb[4].mxu0  ;;  %v332_v61 = vpop.f32.mrb[4].mxu1 }
  0xe2   :  { %v1823_v62 = vpack.c.bf16 %v601_v54, %v593_v52  ;;  %v1839_v63 = vpack.c.bf16 %v603_v55, %v595_v53  ;;  %v221_v0 = vpop.f32.mrb[5].mxu0  ;;  %v334_v1 = vpop.f32.mrb[5].mxu1  ;;  %v220_v6 = vadd.f32 %v219_v60, %v2181_v39  ;;  %v333_v7 = vadd.f32 %v332_v61, %v2181_v39 }
  0xe3   :  { %v1821_v3 = vpack.c.bf16 %v602_v58, %v594_v56  ;;  %v1837_v5 = vpack.c.bf16 %v604_v59, %v596_v57  ;;  %v222_v8 = vadd.f32 %v221_v0, %v2181_v39  ;;  %v335_v9 = vadd.f32 %v334_v1, %v2181_v39  ;;  %v2213_v1 = vpop.permute.xlu0 %83 }
  0xe4   :  { %v609_v18 = vmax.f32 %v220_v6, 0.0  ;;  %v611_v19 = vmax.f32 %v333_v7, 0.0  ;;  %v2215_v6 = vpop.permute.xlu1 %88 }
  0xe5   :  { %v225_v10 = vpop.f32.mrb[6].mxu0  ;;  %v338_v11 = vpop.f32.mrb[6].mxu1  ;;  %1822 = vmatprep.subr.bf16.mxu0 %v1821_v3  ;;  %1838 = vmatprep.subr.bf16.mxu1 %v1837_v5  ;;  %v610_v22 = vmax.f32 %v222_v8, 0.0  ;;  %v612_v23 = vmax.f32 %v335_v9, 0.0 }
  0xe6   :  { %v226_v12 = vadd.f32 %v225_v10, %v2191_v2  ;;  %v339_v13 = vadd.f32 %v338_v11, %v2191_v2  ;;  %v227_v14 = vpop.f32.mrb[7].mxu0  ;;  %v340_v15 = vpop.f32.mrb[7].mxu1  ;;  %1824 = vmatpush1.bf16.msra.mxu0 %v1823_v62  ;;  %1840 = vmatpush1.bf16.msra.mxu1 %v1839_v63 }
  0xe7   :  { %v228_v16 = vadd.f32 %v227_v14, %v2191_v2  ;;  %v341_v17 = vadd.f32 %v340_v15, %v2191_v2 }
  0xe8   :  { %v617_v20 = vmax.f32 %v226_v12, 0.0  ;;  %v619_v21 = vmax.f32 %v339_v13, 0.0 }
  0xe9   :  { %v618_v24 = vmax.f32 %v228_v16, 0.0  ;;  %v620_v25 = vmax.f32 %v341_v17, 0.0  ;;  %v231_v26 = vpop.f32.mrb[8].mxu0  ;;  %v344_v27 = vpop.f32.mrb[8].mxu1 }
  0xea   :  { %v1827_v28 = vpack.c.bf16 %v617_v20, %v609_v18  ;;  %v1843_v29 = vpack.c.bf16 %v619_v21, %v611_v19  ;;  %v233_v30 = vpop.f32.mrb[9].mxu0  ;;  %v346_v31 = vpop.f32.mrb[9].mxu1  ;;  %v232_v37 = vadd.f32 %v231_v26, %v2201_v32  ;;  %v345_v40 = vadd.f32 %v344_v27, %v2201_v32 }
  0xeb   :  { %v1825_v34 = vpack.c.bf16 %v618_v24, %v610_v22  ;;  %v1841_v35 = vpack.c.bf16 %v620_v25, %v612_v23  ;;  %v234_v41 = vadd.f32 %v233_v30, %v2201_v32  ;;  %v347_v42 = vadd.f32 %v346_v31, %v2201_v32 }
  0xec   :  { %v625_v51 = vmax.f32 %v232_v37, 0.0  ;;  %v627_v52 = vmax.f32 %v345_v40, 0.0 }
  0xed   :  { %v237_v43 = vpop.f32.mrb[10].mxu0  ;;  %v350_v44 = vpop.f32.mrb[10].mxu1  ;;  %1826 = vmatprep.subr.bf16.mxu0 %v1825_v34  ;;  %1842 = vmatprep.subr.bf16.mxu1 %v1841_v35  ;;  %v626_v55 = vmax.f32 %v234_v41, 0.0  ;;  %v628_v56 = vmax.f32 %v347_v42, 0.0 }
  0xee   :  { %v238_v45 = vadd.f32 %v237_v43, %v2203_v36  ;;  %v351_v46 = vadd.f32 %v350_v44, %v2203_v36  ;;  %v239_v47 = vpop.f32.mrb[11].mxu0  ;;  %v352_v48 = vpop.f32.mrb[11].mxu1  ;;  %1828 = vmatpush1.bf16.msra.mxu0 %v1827_v28  ;;  %1844 = vmatpush1.bf16.msra.mxu1 %v1843_v29 }
  0xef   :  { %v240_v49 = vadd.f32 %v239_v47, %v2203_v36  ;;  %v353_v50 = vadd.f32 %v352_v48, %v2203_v36 }
  0xf0   :  { %v633_v53 = vmax.f32 %v238_v45, 0.0  ;;  %v635_v54 = vmax.f32 %v351_v46, 0.0 }
  0xf1   :  { %v634_v57 = vmax.f32 %v240_v49, 0.0  ;;  %v636_v58 = vmax.f32 %v353_v50, 0.0  ;;  %v243_v59 = vpop.f32.mrb[12].mxu0  ;;  %v356_v60 = vpop.f32.mrb[12].mxu1  ;;  %v2234_v50 = vld [vmem:[%s2422_s2] sm:$0xff] }
  0xf2   :  { %v1831_v61 = vpack.c.bf16 %v633_v53, %v625_v51  ;;  %v1847_v62 = vpack.c.bf16 %v635_v54, %v627_v52  ;;  %v245_v63 = vpop.f32.mrb[13].mxu0  ;;  %v358_v0 = vpop.f32.mrb[13].mxu1  ;;  %v244_v7 = vadd.f32 %v243_v59, %v2213_v1  ;;  %v357_v8 = vadd.f32 %v356_v60, %v2213_v1 }
  0xf3   :  { %v1829_v3 = vpack.c.bf16 %v634_v57, %v626_v55  ;;  %v1845_v5 = vpack.c.bf16 %v636_v58, %v628_v56  ;;  %v246_v9 = vadd.f32 %v245_v63, %v2213_v1  ;;  %v359_v10 = vadd.f32 %v358_v0, %v2213_v1 }
  0xf4   :  { %v641_v19 = vmax.f32 %v244_v7, 0.0  ;;  %v643_v20 = vmax.f32 %v357_v8, 0.0 }
  0xf5   :  { %v249_v11 = vpop.f32.mrb[14].mxu0  ;;  %v362_v12 = vpop.f32.mrb[14].mxu1  ;;  %1830 = vmatprep.subr.bf16.mxu0 %v1829_v3  ;;  %1846 = vmatprep.subr.bf16.mxu1 %v1845_v5  ;;  %v642_v23 = vmax.f32 %v246_v9, 0.0  ;;  %v644_v24 = vmax.f32 %v359_v10, 0.0  ;;  %v2246_v3 = vld [vmem:[%s2422_s2 + $0x8] sm:$0xff] }
  0xf6   :  { %v250_v13 = vadd.f32 %v249_v11, %v2215_v6  ;;  %v363_v14 = vadd.f32 %v362_v12, %v2215_v6  ;;  %v251_v15 = vpop.f32.mrb[15].mxu0  ;;  %v364_v16 = vpop.f32.mrb[15].mxu1  ;;  %1832 = vmatpush1.bf16.msra.mxu0 %v1831_v61  ;;  %1848 = vmatpush1.bf16.msra.mxu1 %v1847_v62 }
  0xf7   :  { %v252_v17 = vadd.f32 %v251_v15, %v2215_v6  ;;  %v365_v18 = vadd.f32 %v364_v16, %v2215_v6 }
  0xf8   :  { %v649_v21 = vmax.f32 %v250_v13, 0.0  ;;  %v651_v22 = vmax.f32 %v363_v14, 0.0 }
  0xf9   :  { %v650_v25 = vmax.f32 %v252_v17, 0.0  ;;  %v652_v26 = vmax.f32 %v365_v18, 0.0  ;;  %v433_v27 = vpop.f32.mrb[16].mxu0  ;;  %v546_v28 = vpop.f32.mrb[16].mxu1 }
  0xfa   :  { %v1835_v29 = vpack.c.bf16 %v649_v21, %v641_v19  ;;  %v1851_v30 = vpack.c.bf16 %v651_v22, %v643_v20  ;;  %v435_v31 = vpop.f32.mrb[17].mxu0  ;;  %v548_v34 = vpop.f32.mrb[17].mxu1  ;;  %v434_v40 = vadd.f32 %v433_v27, %v2177_v33  ;;  %v547_v41 = vadd.f32 %v546_v28, %v2177_v33 }
  0xfb   :  { %v1833_v35 = vpack.c.bf16 %v650_v25, %v642_v23  ;;  %v1849_v37 = vpack.c.bf16 %v652_v26, %v644_v24  ;;  %v436_v42 = vadd.f32 %v435_v31, %v2177_v33  ;;  %v549_v43 = vadd.f32 %v548_v34, %v2177_v33 }
  0xfc   :  { %v597_v52 = vmax.f32 %v434_v40, 0.0  ;;  %v599_v53 = vmax.f32 %v547_v41, 0.0 }
  0xfd   :  { %v439_v44 = vpop.f32.mrb[18].mxu0  ;;  %v552_v45 = vpop.f32.mrb[18].mxu1  ;;  %1834 = vmatprep.subr.bf16.mxu0 %v1833_v35  ;;  %1850 = vmatprep.subr.bf16.mxu1 %v1849_v37  ;;  %v598_v56 = vmax.f32 %v436_v42, 0.0  ;;  %v600_v57 = vmax.f32 %v549_v43, 0.0  ;;  %v2276_v35 = vld [vmem:[%s2422_s2 + $0x18] sm:$0xff] }
  0xfe   :  { %v440_v46 = vadd.f32 %v439_v44, %v2179_v38  ;;  %v553_v47 = vadd.f32 %v552_v45, %v2179_v38  ;;  %v441_v48 = vpop.f32.mrb[19].mxu0  ;;  %v554_v49 = vpop.f32.mrb[19].mxu1  ;;  %1836 = vmatpush1.bf16.msra.mxu0 %v1835_v29  ;;  %1852 = vmatpush1.bf16.msra.mxu1 %v1851_v30 }
  0xff   :  { %v442_v33 = vadd.f32 %v441_v48, %v2179_v38  ;;  %v555_v51 = vadd.f32 %v554_v49, %v2179_v38 }
 0x100   :  { %v605_v54 = vmax.f32 %v440_v46, 0.0  ;;  %v607_v55 = vmax.f32 %v553_v47, 0.0 }
 0x101   :  { %v606_v58 = vmax.f32 %v442_v33, 0.0  ;;  %v608_v59 = vmax.f32 %v555_v51, 0.0  ;;  %v445_v60 = vpop.f32.mrb[20].mxu0  ;;  %v558_v61 = vpop.f32.mrb[20].mxu1  ;;  %1793 = vmatmul.mubr.msk.f32.vlgmr.msra.gmra.mrb[32].mxu0 %vm681_vm2, %v2234_v50  ;;  %1797 = vmatmul.mubr.msk.f32.vlgmr.msra.gmra.mrb[32].mxu1 %vm681_vm2, %v2234_v50 }
 0x102   :  { %v1855_v62 = vpack.c.bf16 %v605_v54, %v597_v52  ;;  %v1871_v63 = vpack.c.bf16 %v607_v55, %v599_v53  ;;  %v447_v0 = vpop.f32.mrb[21].mxu0  ;;  %v560_v38 = vpop.f32.mrb[21].mxu1  ;;  %764 = vmatprep.mubr.f32.mxu0 %v1966_v4  ;;  %853 = vmatprep.mubr.f32.mxu1 %v1966_v4  ;;  %v446_v8 = vadd.f32 %v445_v60, %v2181_v39 }
 0x103   :  { %v1853_v5 = vpack.c.bf16 %v606_v58, %v598_v56  ;;  %v1869_v7 = vpack.c.bf16 %v608_v59, %v600_v57  ;;  %v559_v9 = vadd.f32 %v558_v61, %v2181_v39  ;;  %v448_v10 = vadd.f32 %v447_v0, %v2181_v39 }
 0x104   :  { %v561_v11 = vadd.f32 %v560_v38, %v2181_v39  ;;  %v2262_v39 = vld [vmem:[%s2422_s2 + $0x10] sm:$0xff]  ;;  %v613_v20 = vmax.f32 %v446_v8, 0.0 }
 0x105   :  { %v451_v12 = vpop.f32.mrb[22].mxu0  ;;  %v564_v13 = vpop.f32.mrb[22].mxu1  ;;  %1794 = vmatmul.mubr.msk.f32.gmra.mrb[34].mxu0 %vm681_vm2, %v2246_v3  ;;  %1798 = vmatmul.mubr.msk.f32.gmra.mrb[34].mxu1 %vm681_vm2, %v2246_v3  ;;  %v615_v21 = vmax.f32 %v559_v9, 0.0  ;;  %v614_v24 = vmax.f32 %v448_v10, 0.0 }
 0x106   :  { %v452_v14 = vadd.f32 %v451_v12, %v2191_v2  ;;  %v565_v15 = vadd.f32 %v564_v13, %v2191_v2  ;;  %1854 = vmatprep.subr.bf16.mxu0 %v1853_v5  ;;  %1870 = vmatprep.subr.bf16.mxu1 %v1869_v7  ;;  %v453_v16 = vpop.f32.mrb[23].mxu0  ;;  %v566_v17 = vpop.f32.mrb[23].mxu1  ;;  %v616_v25 = vmax.f32 %v561_v11, 0.0 }
 0x107   :  { %v454_v18 = vadd.f32 %v453_v16, %v2191_v2  ;;  %v567_v19 = vadd.f32 %v566_v17, %v2191_v2  ;;  %1856 = vmatpush1.bf16.msra.mxu0 %v1855_v62  ;;  %1872 = vmatpush1.bf16.msra.mxu1 %v1871_v63 }
 0x108   :  { %v621_v22 = vmax.f32 %v452_v14, 0.0  ;;  %v623_v23 = vmax.f32 %v565_v15, 0.0  ;;  %770 = vmatprep.mubr.f32.mxu0 %v1966_v4  ;;  %859 = vmatprep.mubr.f32.mxu1 %v1966_v4 }
 0x109   :  { %v622_v26 = vmax.f32 %v454_v18, 0.0  ;;  %v624_v27 = vmax.f32 %v567_v19, 0.0  ;;  %v457_v28 = vpop.f32.mrb[24].mxu0  ;;  %v570_v29 = vpop.f32.mrb[24].mxu1  ;;  %1795 = vmatmul.mubr.msk.f32.gmra.mrb[36].mxu0 %vm681_vm2, %v2262_v39  ;;  %1799 = vmatmul.mubr.msk.f32.gmra.mrb[36].mxu1 %vm681_vm2, %v2262_v39 }
 0x10a   :  { %v1859_v2 = vpack.c.bf16 %v621_v22, %v613_v20  ;;  %v1875_v30 = vpack.c.bf16 %v623_v23, %v615_v21  ;;  %v459_v31 = vpop.f32.mrb[25].mxu0  ;;  %v572_v34 = vpop.f32.mrb[25].mxu1  ;;  %776 = vmatprep.mubr.f32.mxu0 %v1966_v4  ;;  %865 = vmatprep.mubr.f32.mxu1 %v1966_v4  ;;  %v458_v41 = vadd.f32 %v457_v28, %v2201_v32 }
 0x10b   :  { %v1857_v37 = vpack.c.bf16 %v622_v26, %v614_v24  ;;  %v1873_v40 = vpack.c.bf16 %v624_v27, %v616_v25  ;;  %v571_v42 = vadd.f32 %v570_v29, %v2201_v32  ;;  %v460_v43 = vadd.f32 %v459_v31, %v2201_v32 }
 0x10c   :  { %v573_v44 = vadd.f32 %v572_v34, %v2201_v32  ;;  %v629_v52 = vmax.f32 %v458_v41, 0.0 }
 0x10d   :  { %v463_v45 = vpop.f32.mrb[26].mxu0  ;;  %v576_v46 = vpop.f32.mrb[26].mxu1  ;;  %1796 = vmatmul.mubr.msk.f32.gmra.mrb[38].mxu0 %vm681_vm2, %v2276_v35  ;;  %1800 = vmatmul.mubr.msk.f32.gmra.mrb[38].mxu1 %vm681_vm2, %v2276_v35  ;;  %v631_v53 = vmax.f32 %v571_v42, 0.0  ;;  %v630_v56 = vmax.f32 %v460_v43, 0.0 }
 0x10e   :  { %v464_v47 = vadd.f32 %v463_v45, %v2203_v36  ;;  %v577_v48 = vadd.f32 %v576_v46, %v2203_v36  ;;  %1858 = vmatprep.subr.bf16.mxu0 %v1857_v37  ;;  %1874 = vmatprep.subr.bf16.mxu1 %v1873_v40  ;;  %v465_v49 = vpop.f32.mrb[27].mxu0  ;;  %v578_v33 = vpop.f32.mrb[27].mxu1  ;;  %v632_v57 = vmax.f32 %v573_v44, 0.0 }
 0x10f   :  { %v466_v51 = vadd.f32 %v465_v49, %v2203_v36  ;;  %v579_v32 = vadd.f32 %v578_v33, %v2203_v36  ;;  %1860 = vmatpush1.bf16.msra.mxu0 %v1859_v2  ;;  %1876 = vmatpush1.bf16.msra.mxu1 %v1875_v30  ;;  %v2325_v30 = vpop.permute.xlu0 %663 }
 0x110   :  { %v637_v54 = vmax.f32 %v464_v47, 0.0  ;;  %v639_v55 = vmax.f32 %v577_v48, 0.0  ;;  %936 = vmatprep.mubr.f32.mxu0 %v1966_v4  ;;  %1025 = vmatprep.mubr.f32.mxu1 %v1966_v4 }
 0x111   :  { %v638_v58 = vmax.f32 %v466_v51, 0.0  ;;  %v640_v59 = vmax.f32 %v579_v32, 0.0  ;;  %v469_v60 = vpop.f32.mrb[28].mxu0  ;;  %v582_v61 = vpop.f32.mrb[28].mxu1 }
 0x112   :  { %v1863_v62 = vpack.c.bf16 %v637_v54, %v629_v52  ;;  %v1879_v63 = vpack.c.bf16 %v639_v55, %v631_v53  ;;  %v471_v0 = vpop.f32.mrb[29].mxu0  ;;  %v584_v36 = vpop.f32.mrb[29].mxu1  ;;  %v470_v7 = vadd.f32 %v469_v60, %v2213_v1  ;;  %v583_v8 = vadd.f32 %v582_v61, %v2213_v1 }
 0x113   :  { %v1861_v38 = vpack.c.bf16 %v638_v58, %v630_v56  ;;  %v1877_v5 = vpack.c.bf16 %v640_v59, %v632_v57  ;;  %v472_v9 = vadd.f32 %v471_v0, %v2213_v1  ;;  %v585_v10 = vadd.f32 %v584_v36, %v2213_v1  ;;  %v2337_v61 = vpop.permute.xlu0 %673 }
 0x114   :  { %v645_v19 = vmax.f32 %v470_v7, 0.0  ;;  %v647_v20 = vmax.f32 %v583_v8, 0.0 }
 0x115   :  { %v475_v11 = vpop.f32.mrb[30].mxu0  ;;  %v588_v12 = vpop.f32.mrb[30].mxu1  ;;  %1862 = vmatprep.subr.bf16.mxu0 %v1861_v38  ;;  %1878 = vmatprep.subr.bf16.mxu1 %v1877_v5  ;;  %v646_v22 = vmax.f32 %v472_v9, 0.0  ;;  %v648_v23 = vmax.f32 %v585_v10, 0.0 }
 0x116   :  { %v476_v13 = vadd.f32 %v475_v11, %v2215_v6  ;;  %v589_v14 = vadd.f32 %v588_v12, %v2215_v6  ;;  %v477_v15 = vpop.f32.mrb[31].mxu0  ;;  %v590_v16 = vpop.f32.mrb[31].mxu1  ;;  %1864 = vmatpush1.bf16.msra.mxu0 %v1863_v62  ;;  %1880 = vmatpush1.bf16.msra.mxu1 %v1879_v63 }
 0x117   :  { %v478_v17 = vadd.f32 %v477_v15, %v2215_v6  ;;  %v591_v18 = vadd.f32 %v590_v16, %v2215_v6 }
 0x118   :  { %v653_v21 = vmax.f32 %v476_v13, 0.0  ;;  %v655_v1 = vmax.f32 %v589_v14, 0.0 }
 0x119   :  { %v654_v24 = vmax.f32 %v478_v17, 0.0  ;;  %v656_v25 = vmax.f32 %v591_v18, 0.0 }
 0x11a   :  { %v1867_v26 = vpack.c.bf16 %v653_v21, %v645_v19  ;;  %v1883_v27 = vpack.c.bf16 %v655_v1, %v647_v20 }
 0x11b   :  { %v1865_v28 = vpack.c.bf16 %v654_v24, %v646_v22  ;;  %v1881_v29 = vpack.c.bf16 %v656_v25, %v648_v23 }
 0x11d   :  { %1866 = vmatprep.subr.bf16.mxu0 %v1865_v28  ;;  %1882 = vmatprep.subr.bf16.mxu1 %v1881_v29  ;;  %v2363_v28 = vld [vmem:[%s2423_s3 + $0x8] sm:$0xff] }
 0x11e   :  { %1868 = vmatpush1.bf16.msra.mxu0 %v1867_v26  ;;  %1884 = vmatpush1.bf16.msra.mxu1 %v1883_v27  ;;  %v2352_v27 = vld [vmem:[%s2423_s3] sm:$0xff] }
 0x121   :  { %1801 = vmatmul.mubr.msk.f32.vlgmr.msra.gmra.mrb[40].mxu0 %vm681_vm2, %v2234_v50  ;;  %1805 = vmatmul.mubr.msk.f32.vlgmr.msra.gmra.mrb[40].mxu1 %vm681_vm2, %v2234_v50 }
 0x122   :  { %942 = vmatprep.mubr.f32.mxu0 %v1966_v4  ;;  %1031 = vmatprep.mubr.f32.mxu1 %v1966_v4 }
 0x125   :  { %1802 = vmatmul.mubr.msk.f32.gmra.mrb[42].mxu0 %vm681_vm2, %v2246_v3  ;;  %1806 = vmatmul.mubr.msk.f32.gmra.mrb[42].mxu1 %vm681_vm2, %v2246_v3 }
 0x126   :  { %948 = vmatprep.mubr.f32.mxu0 %v1966_v4  ;;  %1037 = vmatprep.mubr.f32.mxu1 %v1966_v4 }
 0x129   :  { %1803 = vmatmul.mubr.msk.f32.gmra.mrb[44].mxu0 %vm681_vm2, %v2262_v39  ;;  %1807 = vmatmul.mubr.msk.f32.gmra.mrb[44].mxu1 %vm681_vm2, %v2262_v39  ;;  %v2327_v39 = vpop.permute.xlu1 %668 }
 0x12a   :  { %954 = vmatprep.mubr.f32.mxu0 %v1966_v4  ;;  %1043 = vmatprep.mubr.f32.mxu1 %v1966_v4 }
 0x12d   :  { %1804 = vmatmul.mubr.msk.f32.gmra.mrb[46].mxu0 %vm681_vm2, %v2276_v35  ;;  %1808 = vmatmul.mubr.msk.f32.gmra.mrb[46].mxu1 %vm681_vm2, %v2276_v35  ;;  %v2339_v0 = vpop.permute.xlu1 %678 }
 0x12e   :  { %1165 = vmatprep.mubr.f32.mxu0 %v1966_v4  ;;  %1242 = vmatprep.mubr.f32.mxu1 %v1966_v4 }
 0x1d4   :  { %v760_v6 = vpop.f32.mrb[32].mxu0  ;;  %v849_v50 = vpop.f32.mrb[32].mxu1 }
 0x1d5   :  { %v762_v3 = vpop.f32.mrb[33].mxu0  ;;  %v851_v2 = vpop.f32.mrb[33].mxu1  ;;  %v761_v31 = vadd.f32 %v760_v6, %v2325_v30  ;;  %v850_v34 = vadd.f32 %v849_v50, %v2325_v30 }
 0x1d6   :  { %v763_v37 = vadd.f32 %v762_v3, %v2325_v30  ;;  %v852_v35 = vadd.f32 %v851_v2, %v2325_v30 }
 0x1d7   :  { %v1050_v48 = vmax.f32 %v761_v31, 0.0  ;;  %v1052_v49 = vmax.f32 %v850_v34, 0.0 }
 0x1d8   :  { %v766_v40 = vpop.f32.mrb[34].mxu0  ;;  %v855_v41 = vpop.f32.mrb[34].mxu1  ;;  %v1051_v32 = vmax.f32 %v763_v37, 0.0  ;;  %v1053_v52 = vmax.f32 %v852_v35, 0.0 }
 0x1d9   :  { %v767_v42 = vadd.f32 %v766_v40, %v2327_v39  ;;  %v856_v43 = vadd.f32 %v855_v41, %v2327_v39  ;;  %v768_v44 = vpop.f32.mrb[35].mxu0  ;;  %v857_v45 = vpop.f32.mrb[35].mxu1 }
 0x1da   :  { %v769_v46 = vadd.f32 %v768_v44, %v2327_v39  ;;  %v858_v47 = vadd.f32 %v857_v45, %v2327_v39 }
 0x1db   :  { %v1058_v33 = vmax.f32 %v767_v42, 0.0  ;;  %v1060_v51 = vmax.f32 %v856_v43, 0.0 }
 0x1dc   :  { %v1059_v53 = vmax.f32 %v769_v46, 0.0  ;;  %v1061_v54 = vmax.f32 %v858_v47, 0.0  ;;  %v772_v55 = vpop.f32.mrb[36].mxu0  ;;  %v861_v56 = vpop.f32.mrb[36].mxu1 }
 0x1dd   :  { %v1887_v57 = vpack.c.bf16 %v1058_v33, %v1050_v48  ;;  %v1895_v58 = vpack.c.bf16 %v1060_v51, %v1052_v49  ;;  %v774_v59 = vpop.f32.mrb[37].mxu0  ;;  %v863_v60 = vpop.f32.mrb[37].mxu1  ;;  %v773_v36 = vadd.f32 %v772_v55, %v2337_v61  ;;  %v862_v38 = vadd.f32 %v861_v56, %v2337_v61 }
 0x1de   :  { %v1885_v62 = vpack.c.bf16 %v1059_v53, %v1051_v32  ;;  %v1893_v63 = vpack.c.bf16 %v1061_v54, %v1053_v52  ;;  %v775_v5 = vadd.f32 %v774_v59, %v2337_v61  ;;  %v864_v7 = vadd.f32 %v863_v60, %v2337_v61 }
 0x1df   :  { %v1066_v16 = vmax.f32 %v773_v36, 0.0  ;;  %v1068_v17 = vmax.f32 %v862_v38, 0.0 }
 0x1e0   :  { %v778_v8 = vpop.f32.mrb[38].mxu0  ;;  %v867_v9 = vpop.f32.mrb[38].mxu1  ;;  %1886 = vmatprep.subr.bf16.mxu0 %v1885_v62  ;;  %1894 = vmatprep.subr.bf16.mxu1 %v1893_v63  ;;  %v1067_v20 = vmax.f32 %v775_v5, 0.0  ;;  %v1069_v21 = vmax.f32 %v864_v7, 0.0 }
 0x1e1   :  { %v779_v10 = vadd.f32 %v778_v8, %v2339_v0  ;;  %v868_v11 = vadd.f32 %v867_v9, %v2339_v0  ;;  %v780_v12 = vpop.f32.mrb[39].mxu0  ;;  %v869_v13 = vpop.f32.mrb[39].mxu1  ;;  %1888 = vmatpush1.bf16.msra.mxu0 %v1887_v57  ;;  %1896 = vmatpush1.bf16.msra.mxu1 %v1895_v58 }
 0x1e2   :  { %v781_v14 = vadd.f32 %v780_v12, %v2339_v0  ;;  %v870_v15 = vadd.f32 %v869_v13, %v2339_v0 }
 0x1e3   :  { %v1074_v18 = vmax.f32 %v779_v10, 0.0  ;;  %v1076_v19 = vmax.f32 %v868_v11, 0.0 }
 0x1e4   :  { %v1075_v1 = vmax.f32 %v781_v14, 0.0  ;;  %v1077_v22 = vmax.f32 %v870_v15, 0.0 }
 0x1e5   :  { %v1891_v23 = vpack.c.bf16 %v1074_v18, %v1066_v16  ;;  %v1899_v24 = vpack.c.bf16 %v1076_v19, %v1068_v17 }
 0x1e6   :  { %v1889_v25 = vpack.c.bf16 %v1075_v1, %v1067_v20  ;;  %v1897_v26 = vpack.c.bf16 %v1077_v22, %v1069_v21 }
 0x1e8   :  { %1890 = vmatprep.subr.bf16.mxu0 %v1889_v25  ;;  %1898 = vmatprep.subr.bf16.mxu1 %v1897_v26  ;;  %v1087_v26 = vpop.permute.xlu0 %1086 }
 0x1e9   :  { %1892 = vmatpush1.bf16.msra.mxu0 %v1891_v23  ;;  %1900 = vmatpush1.bf16.msra.mxu1 %v1899_v24 }
 0x1ec   :  { %1809 = vmatmul.mubr.msk.f32.vlgmr.msra.gmra.mrb[48].mxu0 %vm1094_vm3, %v2352_v27  ;;  %1811 = vmatmul.mubr.msk.f32.vlgmr.msra.gmra.mrb[48].mxu1 %vm1094_vm3, %v2352_v27 }
 0x1ed   :  { %1171 = vmatprep.mubr.f32.mxu0 %v1966_v4  ;;  %1248 = vmatprep.mubr.f32.mxu1 %v1966_v4 }
 0x1f0   :  { %1810 = vmatmul.mubr.msk.f32.gmra.mrb[50].mxu0 %vm1094_vm3, %v2363_v28  ;;  %1812 = vmatmul.mubr.msk.f32.gmra.mrb[50].mxu1 %vm1094_vm3, %v2363_v28 }
 0x1f1   :  { %1319 = vmatprep.mubr.f32.mxu0 %v1966_v4  ;;  %1396 = vmatprep.mubr.f32.mxu1 %v1966_v4 }
 0x1f4   :  { %v938_v29 = vpop.f32.mrb[40].mxu0  ;;  %v1027_v6 = vpop.f32.mrb[40].mxu1 }
 0x1f5   :  { %v940_v50 = vpop.f32.mrb[41].mxu0  ;;  %v1029_v3 = vpop.f32.mrb[41].mxu1  ;;  %v939_v2 = vadd.f32 %v938_v29, %v2325_v30  ;;  %v1028_v31 = vadd.f32 %v1027_v6, %v2325_v30 }
 0x1f6   :  { %v941_v34 = vadd.f32 %v940_v50, %v2325_v30  ;;  %v1030_v37 = vadd.f32 %v1029_v3, %v2325_v30 }
 0x1f7   :  { %v1054_v47 = vmax.f32 %v939_v2, 0.0  ;;  %v1056_v48 = vmax.f32 %v1028_v31, 0.0 }
 0x1f8   :  { %v944_v35 = vpop.f32.mrb[42].mxu0  ;;  %v1033_v40 = vpop.f32.mrb[42].mxu1  ;;  %v1055_v51 = vmax.f32 %v941_v34, 0.0  ;;  %v1057_v32 = vmax.f32 %v1030_v37, 0.0 }
 0x1f9   :  { %v945_v41 = vadd.f32 %v944_v35, %v2327_v39  ;;  %v1034_v42 = vadd.f32 %v1033_v40, %v2327_v39  ;;  %v946_v43 = vpop.f32.mrb[43].mxu0  ;;  %v1035_v44 = vpop.f32.mrb[43].mxu1 }
 0x1fa   :  { %v947_v45 = vadd.f32 %v946_v43, %v2327_v39  ;;  %v1036_v46 = vadd.f32 %v1035_v44, %v2327_v39 }
 0x1fb   :  { %v1062_v49 = vmax.f32 %v945_v41, 0.0  ;;  %v1064_v33 = vmax.f32 %v1034_v42, 0.0 }
 0x1fc   :  { %v1063_v52 = vmax.f32 %v947_v45, 0.0  ;;  %v1065_v30 = vmax.f32 %v1036_v46, 0.0  ;;  %v950_v53 = vpop.f32.mrb[44].mxu0  ;;  %v1039_v54 = vpop.f32.mrb[44].mxu1 }
 0x1fd   :  { %v1903_v55 = vpack.c.bf16 %v1062_v49, %v1054_v47  ;;  %v1911_v56 = vpack.c.bf16 %v1064_v33, %v1056_v48  ;;  %v952_v57 = vpop.f32.mrb[45].mxu0  ;;  %v1041_v58 = vpop.f32.mrb[45].mxu1  ;;  %v951_v62 = vadd.f32 %v950_v53, %v2337_v61  ;;  %v1040_v39 = vadd.f32 %v1039_v54, %v2337_v61 }
 0x1fe   :  { %v1901_v59 = vpack.c.bf16 %v1063_v52, %v1055_v51  ;;  %v1909_v60 = vpack.c.bf16 %v1065_v30, %v1057_v32  ;;  %v953_v63 = vadd.f32 %v952_v57, %v2337_v61  ;;  %v1042_v36 = vadd.f32 %v1041_v58, %v2337_v61  ;;  %v1425_v30 = vld [vmem:[%s2424_s4] sm:$0x7]  ;;  %s1968_s4 = smov [#allocation2]  }
 0x1ff   :  { %v1070_v13 = vmax.f32 %v951_v62, 0.0  ;;  %v1072_v14 = vmax.f32 %v1040_v39, 0.0  ;;  %s1745_s10 = sshll.u32 %s1968_s4, 4  ;;  %s1746_s10 = int_to_ptr.vmem [resolvable:$true] %s1745_s10 }
 0x200   :  { %v956_v38 = vpop.f32.mrb[46].mxu0  ;;  %v1045_v5 = vpop.f32.mrb[46].mxu1  ;;  %1902 = vmatprep.subr.bf16.mxu0 %v1901_v59  ;;  %1910 = vmatprep.subr.bf16.mxu1 %v1909_v60  ;;  %v1071_v16 = vmax.f32 %v953_v63, 0.0  ;;  %v1073_v17 = vmax.f32 %v1042_v36, 0.0  ;;  %s1942_s11 = scalar_lea.vmem %s1746_s10, 512  ;;  %p1947_p1 = scmp.lt.s32.totalorder %s1746_s10, %s1746_s10 }
 0x201   :  { %v957_v7 = vadd.f32 %v956_v38, %v2339_v0  ;;  %v1046_v8 = vadd.f32 %v1045_v5, %v2339_v0  ;;  %v958_v9 = vpop.f32.mrb[47].mxu0  ;;  %v1047_v10 = vpop.f32.mrb[47].mxu1  ;;  %1904 = vmatpush1.bf16.msra.mxu0 %v1903_v55  ;;  %1912 = vmatpush1.bf16.msra.mxu1 %v1911_v56  ;;  %p1943_p0 = scmp.ne.s32.totalorder %s1746_s10, %s1942_s11  ;;  %p1948_p2 = scmp.lt.s32.totalorder %s1942_s11, %s1942_s11 }
 0x202   :  { %v959_v11 = vadd.f32 %v958_v9, %v2339_v0  ;;  %v1048_v12 = vadd.f32 %v1047_v10, %v2339_v0 }
 0x203   :  { %v1078_v15 = vmax.f32 %v957_v7, 0.0  ;;  %v1080_v61 = vmax.f32 %v1046_v8, 0.0  ;;  %p1949_p3 = por %p1948_p2, %p1947_p1 }
 0x204   :  { %v1079_v18 = vmax.f32 %v959_v11, 0.0  ;;  %v1081_v19 = vmax.f32 %v1048_v12, 0.0 }
 0x205   :  { %v1907_v20 = vpack.c.bf16 %v1078_v15, %v1070_v13  ;;  %v1915_v21 = vpack.c.bf16 %v1080_v61, %v1072_v14  ;;  %p1950_p4 = pnand %p1949_p3, %p1943_p0 }
 0x206   :  { %v1905_v1 = vpack.c.bf16 %v1079_v18, %v1071_v16  ;;  %v1913_v22 = vpack.c.bf16 %v1081_v19, %v1073_v17  ;;  %v1429_v19 = vpop.permute.xlu0 %1428 }
 0x208   :  { %1906 = vmatprep.subr.bf16.mxu0 %v1905_v1  ;;  %1914 = vmatprep.subr.bf16.mxu1 %v1913_v22 }
 0x209   :  { %1908 = vmatpush1.bf16.msra.mxu0 %v1907_v20  ;;  %1916 = vmatpush1.bf16.msra.mxu1 %v1915_v21 }
 0x20c   :  { %1813 = vmatmul.mubr.msk.f32.vlgmr.msra.gmra.mrb[52].mxu0 %vm1094_vm3, %v2352_v27  ;;  %1815 = vmatmul.mubr.msk.f32.vlgmr.msra.gmra.mrb[52].mxu1 %vm1094_vm3, %v2352_v27  ;;  %v1092_v27 = vpop.permute.xlu1 %1091 }
 0x20d   :  { %1325 = vmatprep.mubr.f32.mxu0 %v1966_v4  ;;  %1402 = vmatprep.mubr.f32.mxu1 %v1966_v4 }
 0x210   :  { %1814 = vmatmul.mubr.msk.f32.gmra.mrb[54].mxu0 %vm1094_vm3, %v2363_v28  ;;  %1816 = vmatmul.mubr.msk.f32.gmra.mrb[54].mxu1 %vm1094_vm3, %v2363_v28 }
 0x211   :  { %1499 = vmatprep.mubr.f32.mxu0 %v1966_v4  ;;  %1570 = vmatprep.mubr.f32.mxu1 %v1966_v4 }
 0x2bf   :  { %v1167_v0 = vpop.f32.mrb[48].mxu0  ;;  %v1244_v23 = vpop.f32.mrb[48].mxu1 }
 0x2c0   :  { %v1169_v24 = vpop.f32.mrb[49].mxu0  ;;  %v1246_v25 = vpop.f32.mrb[49].mxu1  ;;  %v1168_v29 = vadd.f32 %v1167_v0, %v1087_v26  ;;  %v1245_v6 = vadd.f32 %v1244_v23, %v1087_v26 }
 0x2c1   :  { %v1170_v50 = vadd.f32 %v1169_v24, %v1087_v26  ;;  %v1247_v3 = vadd.f32 %v1246_v25, %v1087_v26 }
 0x2c2   :  { %v1409_v42 = vmax.f32 %v1168_v29, 0.0  ;;  %v1411_v43 = vmax.f32 %v1245_v6, 0.0 }
 0x2c3   :  { %v1173_v2 = vpop.f32.mrb[50].mxu0  ;;  %v1250_v31 = vpop.f32.mrb[50].mxu1  ;;  %v1410_v46 = vmax.f32 %v1170_v50, 0.0  ;;  %v1412_v47 = vmax.f32 %v1247_v3, 0.0 }
 0x2c4   :  { %v1174_v34 = vadd.f32 %v1173_v2, %v1092_v27  ;;  %v1251_v37 = vadd.f32 %v1250_v31, %v1092_v27  ;;  %v1175_v35 = vpop.f32.mrb[51].mxu0  ;;  %v1252_v28 = vpop.f32.mrb[51].mxu1 }
 0x2c5   :  { %v1176_v40 = vadd.f32 %v1175_v35, %v1092_v27  ;;  %v1253_v41 = vadd.f32 %v1252_v28, %v1092_v27 }
 0x2c6   :  { %v1417_v44 = vmax.f32 %v1174_v34, 0.0  ;;  %v1419_v45 = vmax.f32 %v1251_v37, 0.0 }
 0x2c7   :  { %v1418_v48 = vmax.f32 %v1176_v40, 0.0  ;;  %v1420_v49 = vmax.f32 %v1253_v41, 0.0 }
 0x2c8   :  { %v1919_v33 = vpack.c.bf16 %v1417_v44, %v1409_v42  ;;  %v1923_v51 = vpack.c.bf16 %v1419_v45, %v1411_v43 }
 0x2c9   :  { %v1917_v32 = vpack.c.bf16 %v1418_v48, %v1410_v46  ;;  %v1921_v52 = vpack.c.bf16 %v1420_v49, %v1412_v47 }
 0x2cb   :  { %1918 = vmatprep.subr.bf16.mxu0 %v1917_v32  ;;  %1922 = vmatprep.subr.bf16.mxu1 %v1921_v52 }
 0x2cc   :  { %1920 = vmatpush1.bf16.msra.mxu0 %v1919_v33  ;;  %1924 = vmatpush1.bf16.msra.mxu1 %v1923_v51 }
 0x2cf   :  { %1817 = vmatmul.mubr.msk.f32.vlgmr.msra.gmra.mrb[56].mxu0 %vm1431_vm4, %v1425_v30  ;;  %1818 = vmatmul.mubr.msk.f32.vlgmr.msra.gmra.mrb[56].mxu1 %vm1431_vm4, %v1425_v30 }
 0x2d0   :  { %1641 = vmatprep.mubr.f32.mxu0 %v1966_v4  ;;  %1712 = vmatprep.mubr.f32.mxu1 %v1966_v4 }
 0x2df   :  { %v1321_v53 = vpop.f32.mrb[52].mxu0  ;;  %v1398_v54 = vpop.f32.mrb[52].mxu1 }
 0x2e0   :  { %v1323_v55 = vpop.f32.mrb[53].mxu0  ;;  %v1400_v56 = vpop.f32.mrb[53].mxu1  ;;  %v1322_v57 = vadd.f32 %v1321_v53, %v1087_v26  ;;  %v1399_v58 = vadd.f32 %v1398_v54, %v1087_v26 }
 0x2e1   :  { %v1324_v59 = vadd.f32 %v1323_v55, %v1087_v26  ;;  %v1401_v60 = vadd.f32 %v1400_v56, %v1087_v26 }
 0x2e2   :  { %v1413_v9 = vmax.f32 %v1322_v57, 0.0  ;;  %v1415_v10 = vmax.f32 %v1399_v58, 0.0 }
 0x2e3   :  { %v1327_v62 = vpop.f32.mrb[54].mxu0  ;;  %v1404_v39 = vpop.f32.mrb[54].mxu1  ;;  %v1414_v12 = vmax.f32 %v1324_v59, 0.0  ;;  %v1416_v13 = vmax.f32 %v1401_v60, 0.0 }
 0x2e4   :  { %v1328_v63 = vadd.f32 %v1327_v62, %v1092_v27  ;;  %v1405_v36 = vadd.f32 %v1404_v39, %v1092_v27  ;;  %v1329_v38 = vpop.f32.mrb[55].mxu0  ;;  %v1406_v5 = vpop.f32.mrb[55].mxu1 }
 0x2e5   :  { %v1330_v7 = vadd.f32 %v1329_v38, %v1092_v27  ;;  %v1407_v8 = vadd.f32 %v1406_v5, %v1092_v27 }
 0x2e6   :  { %v1421_v11 = vmax.f32 %v1328_v63, 0.0  ;;  %v1423_v4 = vmax.f32 %v1405_v36, 0.0 }
 0x2e7   :  { %v1422_v14 = vmax.f32 %v1330_v7, 0.0  ;;  %v1424_v15 = vmax.f32 %v1407_v8, 0.0 }
 0x2e8   :  { %v1927_v61 = vpack.c.bf16 %v1421_v11, %v1413_v9  ;;  %v1931_v16 = vpack.c.bf16 %v1423_v4, %v1415_v10 }
 0x2e9   :  { %v1925_v17 = vpack.c.bf16 %v1422_v14, %v1414_v12  ;;  %v1929_v18 = vpack.c.bf16 %v1424_v15, %v1416_v13 }
 0x2eb   :  { %1926 = vmatprep.subr.bf16.mxu0 %v1925_v17  ;;  %1930 = vmatprep.subr.bf16.mxu1 %v1929_v18 }
 0x2ec   :  { %1928 = vmatpush1.bf16.msra.mxu0 %v1927_v61  ;;  %1932 = vmatpush1.bf16.msra.mxu1 %v1931_v16 }
 0x2ef   :  { %1819 = vmatmul.mubr.msk.f32.vlgmr.msra.gmra.mrb[58].mxu0 %vm1431_vm4, %v1425_v30  ;;  %1820 = vmatmul.mubr.msk.f32.vlgmr.msra.gmra.mrb[58].mxu1 %vm1431_vm4, %v1425_v30 }
 0x3a2   :  { %v1501_v20 = vpop.f32.mrb[56].mxu0  ;;  %v1572_v21 = vpop.f32.mrb[56].mxu1 }
 0x3a3   :  { %v1502_v1 = vadd.f32 %v1501_v20, %v1429_v19  ;;  %v1573_v22 = vadd.f32 %v1572_v21, %v1429_v19  ;;  %v1503_v0 = vpop.f32.mrb[57].mxu0  ;;  %v1574_v23 = vpop.f32.mrb[57].mxu1 }
 0x3a4   :  { %v1504_v24 = vadd.f32 %v1503_v0, %v1429_v19  ;;  %v1575_v25 = vadd.f32 %v1574_v23, %v1429_v19 }
 0x3a6   :  { %v1727_v26 = vcombine.low %v1502_v1, %v1504_v24  ;;  %v1728_v27 = vcombine.low %v1573_v22, %v1575_v25 }
 0x3a8   :  { %1735 = vst [vmem:[#allocation2] sm:$0x77] %v1727_v26  ;;  %1736 = vst [vmem:[#allocation2 + $0x8] sm:$0x77] %v1728_v27 }
 0x3c2   :  { %v1643_v29 = vpop.f32.mrb[58].mxu0  ;;  %v1714_v6 = vpop.f32.mrb[58].mxu1 }
 0x3c3   :  { %v1644_v50 = vadd.f32 %v1643_v29, %v1429_v19  ;;  %v1715_v3 = vadd.f32 %v1714_v6, %v1429_v19  ;;  %v1645_v2 = vpop.f32.mrb[59].mxu0  ;;  %v1716_v31 = vpop.f32.mrb[59].mxu1 }
 0x3c4   :  { %v1646_v34 = vadd.f32 %v1645_v2, %v1429_v19  ;;  %v1717_v37 = vadd.f32 %v1716_v31, %v1429_v19 }
 0x3c6   :  { %v1729_v35 = vcombine.low %v1644_v50, %v1646_v34  ;;  %v1730_v28 = vcombine.low %v1715_v3, %v1717_v37 }
 0x3c8   :  { %1737 = vst [vmem:[#allocation2 + $0x10] sm:$0x77] %v1729_v35  ;;  %1738 = vst [vmem:[#allocation2 + $0x18] sm:$0x77] %v1730_v28 }
 0x3c9   :  { %1953 = shalt.err (!%p1950_p4)
}
 0x3ca   :  { %s1954_s14 = scalar_lea.hbm %s2426_s6, 512 }
 0x3cb   :  { %p1955_p5 = scmp.ne.s32.totalorder %s2426_s6, %s1954_s14  ;;  %p1958_p6 = scmp.lt.u32.totalorder %s1954_s14, %s2426_s6 }
 0x3cd   :  { %p1960_p7 = pnand %p1958_p6, %p1955_p5 }
 0x3cf   :  { %1963 = shalt.err (!%p1960_p7)
}
 0x3d0   :  { %1748 = dma.vmem_to_hbm [thread:$0]  %s1746_s10, 512, %s2426_s6, [#allocation3]  }
 0x3d1   :  { %1964 = dma.done.wait [#allocation3], 512  }
 0x3d2   :  { %1965 = vsyncadd [#allocation3], 4294966784 }
 0x3d3   :  { %1752 = vsyncpa [#allocation3], 1 }

</bundles_post_ra>
